<compile_context>
chip_gen: v6e
topology: v6e:2x2x1
jax: 0.10.0
libtpu: 0.0.40
codegen_flags: <defaults>
</compile_context>

<pallas_src>
import functools

import jax
import jax.numpy as jnp
from jax.experimental import pallas as pl
from jax.experimental.pallas import tpu as pltpu


def _round_up(a, b):
    return ((a + b - 1) // b) * b


def _involution_kernel(x_ref, halo_ref, w0_ref, b0_ref, w1_ref, b1_ref, *rest,
                       K, Wp, pad, C_in, C_pad, use_transform):
    """One TN-pixel tile, channel-major (pixels on the 128-lane axis).

    x_ref    : (C_in, TN)           padded-flat pixels of this tile (io dtype)
    halo_ref : (C_in, HALO)         the next HALO pixels (unfold halo)
    w0_ref   : (Cr, C_in)           reduce 1x1 conv weights
    b0_ref   : (Cr, 1)
    w1_ref   : (K*K*C_pad, Cr)      span 1x1 conv, rows pre-expanded per tap/channel,
                                    each tap padded to C_pad (=round_up(C_in,8)) rows
    b1_ref   : (K*K*C_pad, 1)
    rest     : (wt_ref, bt_ref, o_ref) if use_transform else (o_ref,)
    """
    if use_transform:
        wt_ref, bt_ref, o_ref = rest
    else:
        (o_ref,) = rest

    tn = x_ref.shape[1]
    width = tn + halo_ref.shape[1]

    # tile + halo, cast once to f32; both pieces are lane-aligned multiples of 128.
    xcat = jnp.concatenate(
        [x_ref[...].astype(jnp.float32), halo_ref[...].astype(jnp.float32)],
        axis=-1)                                                   # (C_in, width)

    def shifted(s):
        # xcat[:, s:s+tn] realigned on the XLU: rotate left by s (== roll right by
        # width - s), then keep the (aligned) first tn lanes.  s <= HALO so no
        # wrapped element lands inside [0, tn).
        if s == 0:
            return xcat[:, :tn]
        return pltpu.roll(xcat, width - s, axis=1)[:, :tn]

    # centre of each K*K window == the original (unpadded) pixel value
    xc = shifted(pad * Wp + pad)                                   # (C_in, TN)

    # reduce = Conv2d(C_in, Cr, 1) + ReLU   (channel-major => no in-kernel .T)
    red = jnp.dot(w0_ref[...], xc, preferred_element_type=jnp.float32) + b0_ref[...]
    red = jnp.maximum(red, 0.0)                                    # (Cr, TN)

    # span = Conv2d(Cr, K*K*G, 1); rows pre-expanded so rows
    # [kk*C_pad, kk*C_pad + C_in) hold tap kk's weights for channels 0..C_in-1
    # (group broadcast already done; every tap block starts on a sublane tile).
    kern = jnp.dot(w1_ref[...], red, preferred_element_type=jnp.float32) + b1_ref[...]

    # involution aggregation: in-VMEM unfold via XLU-realigned tap views;
    # two interleaved partial sums, initialised by the first taps.
    def tap(kk):
        di, dj = kk // K, kk % K
        return kern[kk * C_pad:kk * C_pad + C_in, :] * shifted(di * Wp + dj)

    if K * K == 1:
        acc = tap(0)
    else:
        acc0, acc1 = tap(0), tap(1)
        for kk in range(2, K * K):
            if kk % 2 == 0:
                acc0 = acc0 + tap(kk)
            else:
                acc1 = acc1 + tap(kk)
        acc = acc0 + acc1                                          # (C_in, TN)

    if use_transform:                                   # Conv2d(C_in, C_out, 1)
        out = jnp.dot(wt_ref[...], acc, preferred_element_type=jnp.float32) + bt_ref[...]
    else:
        out = acc
    o_ref[...] = out.astype(o_ref.dtype)


def involution2d(x_nchw, params, *, K, G, padding, tile_n=None,
                 io_dtype=jnp.bfloat16):
    """Pallas implementation of Involution2D.forward (dilation = 1)."""
    w0, b0, w1, b1, wt, bt = params
    B, C_in, H, W = x_nchw.shape
    assert C_in % G == 0, "in_channels must be divisible by groups"
    assert 2 * padding + 1 == K, "kernel_size must equal 2*padding + 1 (dilation=1)"
    Cg = C_in // G
    KK = K * K
    Cr = w0.shape[0]
    C_out = wt.shape[0] if wt is not None else C_in
    # The PyTorch module only applies its 1x1 transform when in_channel != out_channel.
    use_transform = (C_out != C_in)

    p = padding
    Hp, Wp = H + 2 * p, W + 2 * p

    # ---- layout plumbing (free): NCHW -> channel-major, padded-flat pixels ----
    xp = jnp.pad(x_nchw, ((0, 0), (0, 0), (p, p), (p, p)))
    x_cm = jnp.transpose(xp, (1, 0, 2, 3)).reshape(C_in, B * Hp * Wp)
    x_cm = x_cm.astype(io_dtype)            # bf16 streaming halves HBM traffic

    N_out = B * Hp * Wp                     # outputs computed on the padded grid
    S = (K - 1) * (Wp + 1)                  # largest in-tile shift (unfold halo)
    HALO = max(128, _round_up(S, 128))      # halo block, lane aligned

    # ---- tile sizing ----
    # Big tiles amortize the ~0.35us/step overhead and shrink the duplicated-halo
    # fraction (v5e/v6e); cap so there are >= ~4 roughly balanced grid steps so
    # v7x's two TensorCores both get work from dimension_semantics=("parallel",).
    if tile_n is None:
        tile_n = 1024
        if N_out > 512:
            tile_n = min(tile_n, _round_up(pl.cdiv(N_out, 4), 128))
        tile_n = max(tile_n, 256)
    tile_n = _round_up(max(tile_n, HALO), HALO)          # halo spec needs tile_n % HALO == 0

    num_tiles = pl.cdiv(N_out, tile_n)
    n_pad = num_tiles * tile_n + HALO                    # keep all blocks in-bounds
    x_cm = jnp.pad(x_cm, ((0, 0), (0, n_pad - N_out)))

    # ---- one-time weight plumbing (no in-kernel transposes / gathers) ----
    # kern row layout: per tap kk a sublane-aligned block of C_pad rows; its first
    # C_in rows are tap kk's involution weights for channels 0..C_in-1
    # (span row (c // Cg)*KK + kk); the pad rows are zero and never read.
    C_pad = _round_up(C_in, 8)
    rows = (jnp.arange(C_in) // Cg)[None, :] * KK + jnp.arange(KK)[:, None]   # (KK, C_in)
    w1e = jnp.zeros((KK, C_pad, Cr), w1.dtype).at[:, :C_in, :].set(w1[rows])
    w1e = w1e.reshape(KK * C_pad, Cr)                    # (KK*C_pad, Cr)
    b1e = jnp.zeros((KK, C_pad), b1.dtype).at[:, :C_in].set(b1[rows]).reshape(-1, 1)
    b0e = b0.reshape(-1, 1)                              # (Cr, 1)

    kern_args = [x_cm, x_cm, w0, b0e, w1e, b1e]
    in_specs = [
        # main pixel block (lane-dense).  If a profile shows exposed DMA on large
        # inputs, add pipeline_mode=pl.Buffered(3) here (one extra C_in*tile_n buf).
        pl.BlockSpec((C_in, tile_n), lambda i: (0, i)),
        # halo: the next HALO pixels of the same array (requires tile_n % HALO == 0)
        pl.BlockSpec((C_in, HALO), lambda i: (0, (i + 1) * (tile_n // HALO))),
        pl.BlockSpec(w0.shape, lambda i: (0, 0)),
        pl.BlockSpec(b0e.shape, lambda i: (0, 0)),
        pl.BlockSpec(w1e.shape, lambda i: (0, 0)),
        pl.BlockSpec(b1e.shape, lambda i: (0, 0)),
    ]
    if use_transform:
        bte = bt.reshape(-1, 1)
        kern_args += [wt, bte]
        in_specs += [pl.BlockSpec(wt.shape, lambda i: (0, 0)),
                     pl.BlockSpec(bte.shape, lambda i: (0, 0))]

    kernel = functools.partial(_involution_kernel, K=K, Wp=Wp, pad=p,
                               C_in=C_in, C_pad=C_pad, use_transform=use_transform)

    out_flat = pl.pallas_call(
        kernel,
        out_shape=jax.ShapeDtypeStruct((C_out, num_tiles * tile_n), io_dtype),
        grid_spec=pltpu.PrefetchScalarGridSpec(
            num_scalar_prefetch=0,
            grid=(num_tiles,),
            in_specs=in_specs,
            out_specs=pl.BlockSpec((C_out, tile_n), lambda i: (0, i)),
        ),
        compiler_params=pltpu.CompilerParams(
            dimension_semantics=("parallel",),          # megacore / v7x 2-TC shardable
            vmem_limit_bytes=32 * 1024 * 1024,          # safe on v5e/v6e/v7x; usage ~1-2 MiB
        ),
    )(*kern_args)

    # discard padded-grid junk columns/rows; back to NCHW and the input dtype
    out = out_flat[:, :N_out].reshape(C_out, B, Hp, Wp)[:, :, :H, :W]
    return jnp.transpose(out, (1, 0, 2, 3)).astype(x_nchw.dtype)


def involution2d_ref(x, params, *, K, G, padding):
    """Pure-JAX reference mirroring the PyTorch forward exactly."""
    w0, b0, w1, b1, wt, bt = params
    B, C, H, W = x.shape
    C_out = wt.shape[0]
    KK = K * K
    red = jnp.einsum('bchw,dc->bdhw', x, w0) + b0[None, :, None, None]
    red = jnp.maximum(red, 0.0)
    span = jnp.einsum('bchw,dc->bdhw', red, w1) + b1[None, :, None, None]
    xp = jnp.pad(x, ((0, 0), (0, 0), (padding, padding), (padding, padding)))
    xu = jnp.stack([xp[:, :, i:i + H, j:j + W] for i in range(K) for j in range(K)],
                   axis=2)                                            # (B,C,KK,H,W)
    xu = xu.reshape(B, G, C // G, KK, H, W)
    kern = span.reshape(B, G, KK, H, W)[:, :, None]                   # (B,G,1,KK,H,W)
    out = (kern * xu).sum(axis=3).reshape(B, C, H, W)
    if C != C_out:
        out = jnp.einsum('bchw,dc->bdhw', out, wt) + bt[None, :, None, None]
    return out


if __name__ == "__main__":
    # Module config: Involution2D(in_channel=4, out_channel=8, kernel_size=3,
    #                             Group=2, padding=1, reduction_ratio=1)
    B, C_in, C_out, H, W = 2, 4, 8, 16, 16
    K, G, padding, r = 3, 2, 1, 1
    Cr = C_in // r

    key = jax.random.PRNGKey(0)
    ks = jax.random.split(key, 7)
    x = jax.random.normal(ks[0], (B, C_in, H, W), jnp.float32)

    # deterministic parameter init (synthetic weights, not a checkpoint)
    w0 = 0.2 * jax.random.normal(ks[1], (Cr, C_in), jnp.float32)       # reduce
    b0 = 0.1 * jax.random.normal(ks[2], (Cr,), jnp.float32)
    w1 = 0.2 * jax.random.normal(ks[3], (K * K * G, Cr), jnp.float32)  # span
    b1 = 0.1 * jax.random.normal(ks[4], (K * K * G,), jnp.float32)
    wt = 0.2 * jax.random.normal(ks[5], (C_out, C_in), jnp.float32)    # transform
    bt = 0.1 * jax.random.normal(ks[6], (C_out,), jnp.float32)
    params = (w0, b0, w1, b1, wt, bt)

    ref = involution2d_ref(x, params, K=K, G=G, padding=padding)

    # 1) f32 I/O path: tight check of the kernel logic against the f32 reference.
    out_f32 = jax.block_until_ready(
        involution2d(x, params, K=K, G=G, padding=padding, io_dtype=jnp.float32))
    assert out_f32.shape == (B, C_out, H, W), out_f32.shape
    err_f32 = float(jnp.max(jnp.abs(out_f32 - ref)))
    assert jnp.allclose(out_f32, ref, rtol=1e-4, atol=1e-4), err_f32

    # 2) bf16 streaming (the performance default): compare against a reference fed
    #    the same bf16-quantized input, so the only residual is the bf16 output
    #    rounding (rel <= 2^-8) plus f32 accumulation-order noise.
    out_bf16 = jax.block_until_ready(
        involution2d(x, params, K=K, G=G, padding=padding))
    assert out_bf16.shape == (B, C_out, H, W), out_bf16.shape
    x_q = x.astype(jnp.bfloat16).astype(jnp.float32)
    ref_q = involution2d_ref(x_q, params, K=K, G=G, padding=padding)
    err_bf16 = float(jnp.max(jnp.abs(out_bf16 - ref_q)))
    assert jnp.allclose(out_bf16, ref_q, rtol=1e-2, atol=1e-2), err_bf16

    print("KERNEL_OK")
</pallas_src>

<mosaic_0001>
module attributes {stable_mosaic.version = 11 : i64} {
  func.func @_involution_kernel(%arg0: i32, %arg1: memref<4x256xf32, #tpu.memory_space<vmem>>, %arg2: memref<4x128xf32, #tpu.memory_space<vmem>>, %arg3: memref<4x4xf32, #tpu.memory_space<vmem>>, %arg4: memref<4x1xf32, #tpu.memory_space<vmem>>, %arg5: memref<72x4xf32, #tpu.memory_space<vmem>>, %arg6: memref<72x1xf32, #tpu.memory_space<vmem>>, %arg7: memref<8x4xf32, #tpu.memory_space<vmem>>, %arg8: memref<8x1xf32, #tpu.memory_space<vmem>>, %arg9: memref<8x256xf32, #tpu.memory_space<vmem>>) attributes {dimension_semantics = [#tpu.dimension_semantics<parallel>], iteration_bounds = array<i64: 3>, scalar_prefetch = 0 : i64, scratch_operands = 0 : i64, tpu.core_type = #tpu.core_type<tc>, window_params = [{transform_indices = @transform_0, window_bounds = array<i64: 4, 256>}, {transform_indices = @transform_1, window_bounds = array<i64: 4, 128>}, {pipeline_mode = #tpu.pipeline_mode<synchronous>, transform_indices = @transform_2, window_bounds = array<i64: 4, 4>}, {pipeline_mode = #tpu.pipeline_mode<synchronous>, transform_indices = @transform_3, window_bounds = array<i64: 4, 1>}, {pipeline_mode = #tpu.pipeline_mode<synchronous>, transform_indices = @transform_4, window_bounds = array<i64: 72, 4>}, {pipeline_mode = #tpu.pipeline_mode<synchronous>, transform_indices = @transform_5, window_bounds = array<i64: 72, 1>}, {pipeline_mode = #tpu.pipeline_mode<synchronous>, transform_indices = @transform_6, window_bounds = array<i64: 8, 4>}, {pipeline_mode = #tpu.pipeline_mode<synchronous>, transform_indices = @transform_7, window_bounds = array<i64: 8, 1>}, {transform_indices = @transform_8, window_bounds = array<i64: 8, 256>}]} {
    %c0 = arith.constant 0 : index
    %c0_0 = arith.constant 0 : index
    %0 = vector.load %arg1[%c0, %c0_0] : memref<4x256xf32, #tpu.memory_space<vmem>>, vector<4x256xf32>
    %c0_1 = arith.constant 0 : index
    %c0_2 = arith.constant 0 : index
    %1 = vector.load %arg2[%c0_1, %c0_2] : memref<4x128xf32, #tpu.memory_space<vmem>>, vector<4x128xf32>
    %2 = tpu.concatenate %0, %1 in 1 : vector<4x256xf32>, vector<4x128xf32> -> vector<4x384xf32>
    %c365_i32 = arith.constant 365 : i32
    %3 = tpu.dynamic_rotate %2 by %c365_i32 dim 1 : vector<4x384xf32>, i32 -> vector<4x384xf32>
    %4 = vector.extract_strided_slice %3 {offsets = [0, 0], sizes = [4, 256], strides = [1, 1]} : vector<4x384xf32> to vector<4x256xf32>
    %c0_3 = arith.constant 0 : index
    %c0_4 = arith.constant 0 : index
    %5 = vector.load %arg3[%c0_3, %c0_4] : memref<4x4xf32, #tpu.memory_space<vmem>>, vector<4x4xf32>
    %cst = arith.constant dense<0.000000e+00> : vector<4x256xf32>
    %6 = tpu.matmul %5, %4, %cst {dimension_numbers = #tpu.dot_dimension_numbers<[1], [0], [0], [1], [0, 0, 1, 1], [], []>} : vector<4x4xf32>, vector<4x256xf32>, vector<4x256xf32> -> vector<4x256xf32>
    %c0_5 = arith.constant 0 : index
    %c0_6 = arith.constant 0 : index
    %7 = vector.load %arg4[%c0_5, %c0_6] : memref<4x1xf32, #tpu.memory_space<vmem>>, vector<4x1xf32>
    %8 = vector.broadcast %7 : vector<4x1xf32> to vector<4x256xf32>
    %9 = arith.addf %6, %8 : vector<4x256xf32>
    %cst_7 = arith.constant 0.000000e+00 : f32
    %10 = vector.broadcast %cst_7 : f32 to vector<4x256xf32>
    %11 = arith.maximumf %9, %10 : vector<4x256xf32>
    %c0_8 = arith.constant 0 : index
    %c0_9 = arith.constant 0 : index
    %12 = vector.load %arg5[%c0_8, %c0_9] : memref<72x4xf32, #tpu.memory_space<vmem>>, vector<72x4xf32>
    %cst_10 = arith.constant dense<0.000000e+00> : vector<72x256xf32>
    %13 = tpu.matmul %12, %11, %cst_10 {dimension_numbers = #tpu.dot_dimension_numbers<[1], [0], [0], [1], [0, 0, 1, 1], [], []>} : vector<72x4xf32>, vector<4x256xf32>, vector<72x256xf32> -> vector<72x256xf32>
    %c0_11 = arith.constant 0 : index
    %c0_12 = arith.constant 0 : index
    %14 = vector.load %arg6[%c0_11, %c0_12] : memref<72x1xf32, #tpu.memory_space<vmem>>, vector<72x1xf32>
    %15 = vector.broadcast %14 : vector<72x1xf32> to vector<72x256xf32>
    %16 = arith.addf %13, %15 : vector<72x256xf32>
    %17 = vector.extract_strided_slice %16 {offsets = [0, 0], sizes = [4, 256], strides = [1, 1]} : vector<72x256xf32> to vector<4x256xf32>
    %18 = vector.extract_strided_slice %2 {offsets = [0, 0], sizes = [4, 256], strides = [1, 1]} : vector<4x384xf32> to vector<4x256xf32>
    %19 = arith.mulf %17, %18 : vector<4x256xf32>
    %20 = vector.extract_strided_slice %16 {offsets = [8, 0], sizes = [4, 256], strides = [1, 1]} : vector<72x256xf32> to vector<4x256xf32>
    %c383_i32 = arith.constant 383 : i32
    %21 = tpu.dynamic_rotate %2 by %c383_i32 dim 1 : vector<4x384xf32>, i32 -> vector<4x384xf32>
    %22 = vector.extract_strided_slice %21 {offsets = [0, 0], sizes = [4, 256], strides = [1, 1]} : vector<4x384xf32> to vector<4x256xf32>
    %23 = arith.mulf %20, %22 : vector<4x256xf32>
    %24 = vector.extract_strided_slice %16 {offsets = [16, 0], sizes = [4, 256], strides = [1, 1]} : vector<72x256xf32> to vector<4x256xf32>
    %c382_i32 = arith.constant 382 : i32
    %25 = tpu.dynamic_rotate %2 by %c382_i32 dim 1 : vector<4x384xf32>, i32 -> vector<4x384xf32>
    %26 = vector.extract_strided_slice %25 {offsets = [0, 0], sizes = [4, 256], strides = [1, 1]} : vector<4x384xf32> to vector<4x256xf32>
    %27 = arith.mulf %24, %26 : vector<4x256xf32>
    %28 = arith.addf %19, %27 : vector<4x256xf32>
    %29 = vector.extract_strided_slice %16 {offsets = [24, 0], sizes = [4, 256], strides = [1, 1]} : vector<72x256xf32> to vector<4x256xf32>
    %c366_i32 = arith.constant 366 : i32
    %30 = tpu.dynamic_rotate %2 by %c366_i32 dim 1 : vector<4x384xf32>, i32 -> vector<4x384xf32>
    %31 = vector.extract_strided_slice %30 {offsets = [0, 0], sizes = [4, 256], strides = [1, 1]} : vector<4x384xf32> to vector<4x256xf32>
    %32 = arith.mulf %29, %31 : vector<4x256xf32>
    %33 = arith.addf %23, %32 : vector<4x256xf32>
    %34 = vector.extract_strided_slice %16 {offsets = [32, 0], sizes = [4, 256], strides = [1, 1]} : vector<72x256xf32> to vector<4x256xf32>
    %c365_i32_13 = arith.constant 365 : i32
    %35 = tpu.dynamic_rotate %2 by %c365_i32_13 dim 1 : vector<4x384xf32>, i32 -> vector<4x384xf32>
    %36 = vector.extract_strided_slice %35 {offsets = [0, 0], sizes = [4, 256], strides = [1, 1]} : vector<4x384xf32> to vector<4x256xf32>
    %37 = arith.mulf %34, %36 : vector<4x256xf32>
    %38 = arith.addf %28, %37 : vector<4x256xf32>
    %39 = vector.extract_strided_slice %16 {offsets = [40, 0], sizes = [4, 256], strides = [1, 1]} : vector<72x256xf32> to vector<4x256xf32>
    %c364_i32 = arith.constant 364 : i32
    %40 = tpu.dynamic_rotate %2 by %c364_i32 dim 1 : vector<4x384xf32>, i32 -> vector<4x384xf32>
    %41 = vector.extract_strided_slice %40 {offsets = [0, 0], sizes = [4, 256], strides = [1, 1]} : vector<4x384xf32> to vector<4x256xf32>
    %42 = arith.mulf %39, %41 : vector<4x256xf32>
    %43 = arith.addf %33, %42 : vector<4x256xf32>
    %44 = vector.extract_strided_slice %16 {offsets = [48, 0], sizes = [4, 256], strides = [1, 1]} : vector<72x256xf32> to vector<4x256xf32>
    %c348_i32 = arith.constant 348 : i32
    %45 = tpu.dynamic_rotate %2 by %c348_i32 dim 1 : vector<4x384xf32>, i32 -> vector<4x384xf32>
    %46 = vector.extract_strided_slice %45 {offsets = [0, 0], sizes = [4, 256], strides = [1, 1]} : vector<4x384xf32> to vector<4x256xf32>
    %47 = arith.mulf %44, %46 : vector<4x256xf32>
    %48 = arith.addf %38, %47 : vector<4x256xf32>
    %49 = vector.extract_strided_slice %16 {offsets = [56, 0], sizes = [4, 256], strides = [1, 1]} : vector<72x256xf32> to vector<4x256xf32>
    %c347_i32 = arith.constant 347 : i32
    %50 = tpu.dynamic_rotate %2 by %c347_i32 dim 1 : vector<4x384xf32>, i32 -> vector<4x384xf32>
    %51 = vector.extract_strided_slice %50 {offsets = [0, 0], sizes = [4, 256], strides = [1, 1]} : vector<4x384xf32> to vector<4x256xf32>
    %52 = arith.mulf %49, %51 : vector<4x256xf32>
    %53 = arith.addf %43, %52 : vector<4x256xf32>
    %54 = vector.extract_strided_slice %16 {offsets = [64, 0], sizes = [4, 256], strides = [1, 1]} : vector<72x256xf32> to vector<4x256xf32>
    %c346_i32 = arith.constant 346 : i32
    %55 = tpu.dynamic_rotate %2 by %c346_i32 dim 1 : vector<4x384xf32>, i32 -> vector<4x384xf32>
    %56 = vector.extract_strided_slice %55 {offsets = [0, 0], sizes = [4, 256], strides = [1, 1]} : vector<4x384xf32> to vector<4x256xf32>
    %57 = arith.mulf %54, %56 : vector<4x256xf32>
    %58 = arith.addf %48, %57 : vector<4x256xf32>
    %59 = arith.addf %58, %53 : vector<4x256xf32>
    %c0_14 = arith.constant 0 : index
    %c0_15 = arith.constant 0 : index
    %60 = vector.load %arg7[%c0_14, %c0_15] : memref<8x4xf32, #tpu.memory_space<vmem>>, vector<8x4xf32>
    %cst_16 = arith.constant dense<0.000000e+00> : vector<8x256xf32>
    %61 = tpu.matmul %60, %59, %cst_16 {dimension_numbers = #tpu.dot_dimension_numbers<[1], [0], [0], [1], [0, 0, 1, 1], [], []>} : vector<8x4xf32>, vector<4x256xf32>, vector<8x256xf32> -> vector<8x256xf32>
    %c0_17 = arith.constant 0 : index
    %c0_18 = arith.constant 0 : index
    %62 = vector.load %arg8[%c0_17, %c0_18] : memref<8x1xf32, #tpu.memory_space<vmem>>, vector<8x1xf32>
    %63 = vector.broadcast %62 : vector<8x1xf32> to vector<8x256xf32>
    %64 = arith.addf %61, %63 : vector<8x256xf32>
    %c0_19 = arith.constant 0 : index
    %c0_20 = arith.constant 0 : index
    %65 = vector.load %arg9[%c0_19, %c0_20] : memref<8x256xf32, #tpu.memory_space<vmem>>, vector<8x256xf32>
    tpu.vector_store %arg9[%c0_19, %c0_20], %64 {strides = array<i32>} : memref<8x256xf32, #tpu.memory_space<vmem>>, vector<8x256xf32>,
    return
  }
  func.func @transform_0(%arg0: i32) -> (i32, i32) {
    %c0_i32 = arith.constant 0 : i32
    %c0_i32_0 = arith.constant 0 : i32
    return %c0_i32, %arg0 : i32, i32
  }
  func.func @transform_1(%arg0: i32) -> (i32, i32) {
    %c1_i32 = arith.constant 1 : i32
    %0 = arith.addi %arg0, %c1_i32 : i32
    %c2_i32 = arith.constant 2 : i32
    %1 = arith.muli %0, %c2_i32 : i32
    %c0_i32 = arith.constant 0 : i32
    %c0_i32_0 = arith.constant 0 : i32
    return %c0_i32, %1 : i32, i32
  }
  func.func @transform_2(%arg0: i32) -> (i32, i32) {
    %c0_i32 = arith.constant 0 : i32
    %c0_i32_0 = arith.constant 0 : i32
    %c0_i32_1 = arith.constant 0 : i32
    return %c0_i32, %c0_i32_0 : i32, i32
  }
  func.func @transform_3(%arg0: i32) -> (i32, i32) {
    %c0_i32 = arith.constant 0 : i32
    %c0_i32_0 = arith.constant 0 : i32
    %c0_i32_1 = arith.constant 0 : i32
    return %c0_i32, %c0_i32_0 : i32, i32
  }
  func.func @transform_4(%arg0: i32) -> (i32, i32) {
    %c0_i32 = arith.constant 0 : i32
    %c0_i32_0 = arith.constant 0 : i32
    %c0_i32_1 = arith.constant 0 : i32
    return %c0_i32, %c0_i32_0 : i32, i32
  }
  func.func @transform_5(%arg0: i32) -> (i32, i32) {
    %c0_i32 = arith.constant 0 : i32
    %c0_i32_0 = arith.constant 0 : i32
    %c0_i32_1 = arith.constant 0 : i32
    return %c0_i32, %c0_i32_0 : i32, i32
  }
  func.func @transform_6(%arg0: i32) -> (i32, i32) {
    %c0_i32 = arith.constant 0 : i32
    %c0_i32_0 = arith.constant 0 : i32
    %c0_i32_1 = arith.constant 0 : i32
    return %c0_i32, %c0_i32_0 : i32, i32
  }
  func.func @transform_7(%arg0: i32) -> (i32, i32) {
    %c0_i32 = arith.constant 0 : i32
    %c0_i32_0 = arith.constant 0 : i32
    %c0_i32_1 = arith.constant 0 : i32
    return %c0_i32, %c0_i32_0 : i32, i32
  }
  func.func @transform_8(%arg0: i32) -> (i32, i32) {
    %c0_i32 = arith.constant 0 : i32
    %c0_i32_0 = arith.constant 0 : i32
    return %c0_i32, %arg0 : i32, i32
  }
}

</mosaic_0001>

<bundles_post_ra>
// kernel: tpu_custom_call.1
= control target key start
LH: loop header
LB: loop body
LE: loop exit
PB: predicated region body
PF: predicated region fallthrough
CT: control target
= control target key end

     0   :  { %13 = vsyncpa [#allocation3], 0  ;;  %s1488_s0 = inlined_call_operand.vmem [shape: f32[4,896], index: 0, kind: input, shape index: {}]   ;;  %s1489_s1 = inlined_call_operand.vmem [shape: f32[4,896], index: 1, kind: input, shape index: {}]   ;;  %s1490_s2 = inlined_call_operand.vmem [shape: f32[4,4], index: 2, kind: input, shape index: {}]   ;;  %s1491_s3 = inlined_call_operand.vmem [shape: f32[4,1], index: 3, kind: input, shape index: {}]   ;;  %s1492_s4 = inlined_call_operand.vmem [shape: f32[72,4], index: 4, kind: input, shape index: {}]   ;;  %s1493_s5 = inlined_call_operand.vmem [shape: f32[72,1], index: 5, kind: input, shape index: {}]   ;;  %s1494_s6 = inlined_call_operand.vmem [shape: f32[8,4], index: 6, kind: input, shape index: {}]   ;;  %s1495_s7 = inlined_call_operand.vmem [shape: f32[8,1], index: 7, kind: input, shape index: {}]   ;;  %s1496_s8 = inlined_call_operand.hbm [shape: f32[8,768], index: 8, kind: output, shape index: {}]  }
   0x1   :  { %15 = vsyncpa [#allocation3 + $0x1], 0  ;;  %s1164_s27 = smov 0   ;;  %s1166_s28 = smov 0  }
   0x2   :  { %s1168_s29 = smov 0   ;;  %s1170_s30 = smov 0  }
   0x3 LB: > { %s1185_s9 = sadd.s32 4294967295, %s1106_s30   ;;  %s952_s10 = sadd.s32 4294967294, %s1106_s30   ;;  %s1106_s30 = sphi %s1170_s30, %s1507_s30   ;;  %s1102_s29 = sphi %s1168_s29, %s1506_s29   ;;  %s1098_s28 = sphi %s1166_s28, %s1505_s28   ;;  %s1094_s27 = sphi %s1164_s27, %s1504_s27  }
   0x4   : > { %s1189_s11 = sadd.s32 1, %s1106_s30   ;;  %s210_s12 = sadd.s32 1, %s1102_s29 }
   0x5   : > { %s207_s13 = ssub.s32 %s1106_s30, %s1189_s11  ;;  %p220_p0 = scmp.ne.s32.totalorder %s1102_s29, %s1098_s28 }
   0x6   : > { %p208_p1 = scmp.eq.s32.totalorder %s207_s13, 0  ;;  %p221_p2 = scmp.eq.s32.totalorder %s1185_s9, 2 }
   0x7   : > { %p226_p3 = scmp.ne.s32.totalorder %s1098_s28, %s1094_s27  ;;  %p227_p4 = scmp.eq.s32.totalorder %s952_s10, 2 }
   0x8   : > { %s1200_s14 = scalar_select %p208_p1, %s1102_s29, %s210_s12  }
   0x9   : > { %p1202_p5 = por %p221_p2, %p220_p0  ;;  %p1206_p6 = por %p227_p4, %p226_p3 }
   0xa   : > { %p957_p7 = scmp.ge.s32.totalorder %s1106_s30, 1  ;;  %p291_p8 = scmp.lt.s32.totalorder %s1106_s30, 4 }
   0xc   : > { %p292_p9 = pnand %p957_p7, %p291_p8 }
   0xd   : > { %s959_s17 = sshll.u32 (!%p292_p9), %s1185_s9, 1  ;;  %s1110_s24 = smov (!%p292_p9), 109  }
   0xe   : > { %295 = sbr.rel (%p292_p9) target bundleno = 783 (0x30f), region = 52  ;;  %p340_p10 = scmp.lt.s32.totalorder (!%p292_p9), %s959_s17, 6 }
   0xf   : > { %s990_s18 = sadd.s32 (!%p292_p9), 2, %s959_s17  ;;  %s1112_s12 = smov (!%p292_p9), 127  }
  0x10   : > { %p351_p11 = scmp.lt.s32.totalorder (!%p292_p9), %s990_s18, 6  ;;  %s1113_s13 = smov (!%p292_p9), 110  }
  0x11   : > { %s1497_s20 = smov (!%p292_p9), 90   ;;  %s332_s21 = sand.u32 (!%p292_p9), 1, %s1098_s28  }
  0x13   : > { %s1509_s17 = smov (!%p340_p10, %s959_s17), 6  ;;  %v1108_v0 = vmov 0.0   ;;  %s1511_s18 = smov (!%p351_p11, %s990_s18), 6  ;;  %v1109_v1 = vmov 0   ;;  %v375_v4 = vld [vmem:[%s1491_s3] sm:$0xf]  ;;  %v369_v12 = vlaneseq }
  0x14   : > { %456 = vmatprep.mubr.f32.mxu0 %v1108_v0  ;;  %643 = vmatprep.mubr.f32.mxu1 %v1108_v0  ;;  %s960_s19 = sshll.u32 %s1509_s17, 2  ;;  %s962_s23 = sshll.u32 %s1511_s18, 2  ;;  %v476_v6 = vld [vmem:[%s1493_s5 + $0x10] sm:$0xff]  ;;  %v475_v7 = vld [vmem:[%s1493_s5 + $0x8] sm:$0xff]  ;;  %v478_v8 = vld [vmem:[%s1493_s5 + $0x20] sm:$0xff]  ;;  %vm385_vm1 = vcmask 1043456  }
  0x15   : > { %1043 = vset.pattern.permute.xlu1 %v1109_v1  ;;  %1044 = vset.pattern.permute.xlu0 %v1109_v1  ;;  %s343_s22 = scalar_lea.vmem %s1488_s0, %s960_s19  ;;  %s354_s10 = scalar_lea.vmem %s1489_s1, %s962_s23  ;;  %v480_v9 = vld [vmem:[%s1493_s5 + $0x30] sm:$0xff]  ;;  %v482_v10 = vld [vmem:[%s1493_s5 + $0x40] sm:$0xff]  ;;  %v1273_v13 = vand.u32 127, %v369_v12  ;;  %vm381_vm2 = vcmask 31744   ;;  %v477_v21 = vld [vmem:[%s1493_s5 + $0x18] sm:$0xff] }
  0x16   : > { %v1218_v2 = vld [vmem:[%s343_s22] sm:$0xff]  ;;  %s1114_s17 = smov 108   ;;  %s1115_s18 = smov 92   ;;  %v479_v22 = vld [vmem:[%s1493_s5 + $0x28] sm:$0xff]  ;;  %v481_v23 = vld [vmem:[%s1493_s5 + $0x38] sm:$0xff] }
  0x17   : > { %363 = vrot.lane.b32.xlu1 %v1218_v2, %s1110_s24  ;;  %v1223_v3 = vcombine.high %v1218_v2, %v1218_v2  ;;  %v1232_v5 = vld [vmem:[%s354_s10] sm:$0xf]  ;;  %s1499_s19 = smov 91   ;;  %vm371_vm0 = vcmp.lt.s32.totalorder %v1273_v13, 109  ;;  %v468_v32 = vld [vmem:[%s1492_s4 + $0x18] sm:$0xff]  ;;  %v466_v33 = vld [vmem:[%s1492_s4 + $0x8] sm:$0xff] }
  0x18   : > { %v778_v11 = vld [vmem:[%s1495_s7] sm:$0xff]  ;;  %v467_v35 = vld [vmem:[%s1492_s4 + $0x10] sm:$0xff]  ;;  %v470_v36 = vld [vmem:[%s1492_s4 + $0x28] sm:$0xff]  ;;  %vm688_vm3 = vcmp.lt.s32.totalorder %v1273_v13, 127  ;;  %vm729_vm4 = vcmp.lt.s32.totalorder %v1273_v13, 108  ;;  %vm699_vm5 = vcmp.lt.s32.totalorder %v1273_v13, 126 }
  0x19   : > { %365 = vrot.lane.b32.xlu0 %v1223_v3, %s1110_s24  ;;  %v374_v18 = vld [vmem:[%s1490_s2] sm:$0xf]  ;;  %v471_v37 = vld [vmem:[%s1492_s4 + $0x30] sm:$0xff]  ;;  %v472_v38 = vld [vmem:[%s1492_s4 + $0x38] sm:$0xff]  ;;  %vm755_vm6 = vcmp.lt.s32.totalorder %v1273_v13, 91  ;;  %vm712_vm7 = vcmp.lt.s32.totalorder %v1273_v13, 110 }
  0x1a   : > { %v474_v20 = vld [vmem:[%s1493_s5] sm:$0xff]  ;;  %vm742_vm8 = vcmp.lt.s32.totalorder %v1273_v13, 92  ;;  %vm768_vm9 = vcmp.lt.s32.totalorder %v1273_v13, 90  ;;  %s958_s22 = sshll.u32 %s332_s21, 4  ;;  %s991_s23 = sshll.u32 %s1185_s9, 8 }
  0x1b   : > { %378 = vperm.xlu1 %1043, %v375_v4   ;;  %v465_v31 = vld [vmem:[%s1492_s4] sm:$0xff]  ;;  %s334_s25 = scalar_lea.vmem [#allocation2], %s958_s22 }
  0x1c   : > { %v469_v34 = vld [vmem:[%s1492_s4 + $0x20] sm:$0xff] }
  0x1d   : > { %367 = vrot.lane.b32.xlu0 %v1232_v5, %s1110_s24  ;;  %s1111_s24 = smov 126   ;;  %v473_v39 = vld [vmem:[%s1492_s4 + $0x40] sm:$0xff] }
  0x1f   : > { %495 = vperm.xlu1 %1043, %v476_v6  }
  0x21   : > { %485 = vperm.xlu0 %1044, %v474_v20  }
  0x23   : > { %490 = vperm.xlu1 %1043, %v475_v7  }
  0x25   : > { %500 = vperm.xlu0 %1044, %v477_v21  }
  0x27   : > { %505 = vperm.xlu1 %1043, %v478_v8  }
  0x29   : > { %510 = vperm.xlu0 %1044, %v479_v22  }
  0x2b   : > { %515 = vperm.xlu1 %1043, %v480_v9  }
  0x2d   : > { %520 = vperm.xlu0 %1044, %v481_v23  }
  0x2f   : > { %525 = vperm.xlu1 %1043, %v482_v10  }
  0x31   : > { %695 = vrot.lane.b32.xlu0 %v1223_v3, %s1111_s24 }
  0x33   : > { %697 = vrot.lane.b32.xlu1 %v1232_v5, %s1111_s24 }
  0x35   : > { %693 = vrot.lane.b32.xlu0 %v1218_v2, %s1111_s24  ;;  %s1503_s24 = smov 90  }
  0x37   : > { %684 = vrot.lane.b32.xlu1 %v1223_v3, %s1112_s12 }
  0x39   : > { %686 = vrot.lane.b32.xlu0 %v1232_v5, %s1112_s12 }
  0x3b   : > { %708 = vrot.lane.b32.xlu1 %v1223_v3, %s1113_s13 }
  0x3d   : > { %710 = vrot.lane.b32.xlu0 %v1232_v5, %s1113_s13 }
  0x3f   : > { %682 = vrot.lane.b32.xlu1 %v1218_v2, %s1112_s12 }
  0x41   : > { %706 = vrot.lane.b32.xlu0 %v1218_v2, %s1113_s13  ;;  %s879_s13 = scalar_lea.hbm %s1496_s8, %s991_s23 }
  0x43   : > { %725 = vrot.lane.b32.xlu1 %v1223_v3, %s1114_s17 }
  0x45   : > { %727 = vrot.lane.b32.xlu0 %v1232_v5, %s1114_s17 }
  0x47   : > { %738 = vrot.lane.b32.xlu1 %v1223_v3, %s1115_s18 }
  0x49   : > { %740 = vrot.lane.b32.xlu0 %v1232_v5, %s1115_s18 }
  0x4b   : > { %723 = vrot.lane.b32.xlu1 %v1218_v2, %s1114_s17  ;;  %s867_s17 = scalar_lea.sflag [#allocation3], %s332_s21 }
  0x4d   : > { %736 = vrot.lane.b32.xlu0 %v1218_v2, %s1115_s18 }
  0x4f   : > { %751 = vrot.lane.b32.xlu1 %v1223_v3, %s1499_s19 }
  0x53   : > { %764 = vrot.lane.b32.xlu1 %v1223_v3, %s1497_s20  ;;  %s1118_s20 = smov [#allocation2]  }
  0x54   : > { %s1050_s9 = sshll.u32 %s1118_s20, 4  ;;  %s1051_s9 = int_to_ptr.vmem [resolvable:$false] %s1050_s9 }
  0x55   : > { %s1052_s26 = scalar_lea.vmem %s1051_s9, 512 }
  0x57   : > { %749 = vrot.lane.b32.xlu1 %v1218_v2, %s1499_s19  ;;  %s1502_s19 = smov 91  }
  0x58   : > { %753 = vrot.lane.b32.xlu0 %v1232_v5, %s1502_s19  ;;  %s881_s19 = sshll.u32 %s334_s25, 4  ;;  %s882_s19 = int_to_ptr.vmem [resolvable:$true] %s881_s19 }
  0x59   : > { %s1046_s18 = scalar_lea.vmem %s882_s19, 256  ;;  %p1053_p1 = scmp.lt.s32.totalorder %s882_s19, %s1051_s9 }
  0x5a   : > { %p1047_p12 = scmp.ne.s32.totalorder %s882_s19, %s1046_s18  ;;  %p1054_p2 = scmp.lt.s32.totalorder %s1052_s26, %s1046_s18 }
  0x5b   : > { %781 = vperm.xlu1 %1043, %v778_v11  }
  0x5c   : > { %766 = vrot.lane.b32.xlu0 %v1232_v5, %s1503_s24  ;;  %p1048_p13 = pnand %p1047_p12, %p1202_p5  ;;  %p1055_p3 = por %p1054_p2, %p1053_p1 }
  0x5e   : > { %p1049_p0 = pneg %p1048_p13 }
  0x60   : > { %762 = vrot.lane.b32.xlu0 %v1218_v2, %s1503_s24  ;;  %p1056_p4 = pnand %p1055_p3, %p1049_p0 }
  0x89   : > { %v364_v15 = vpop.permute.xlu1 %363 }
  0x8b   : > { %v366_v14 = vpop.permute.xlu0 %365 }
  0x8c   : > { %v1283_v19 = vsel %vm371_vm0, %v364_v15, %v366_v14 }
  0x8f   : > { %v368_v16 = vpop.permute.xlu0 %367 }
  0x90   : > { %v1276_v17 = vsel %vm371_vm0, %v366_v14, %v368_v16 }
  0x91   : > { %963 = vmatprep.subr.msk.mxu0 %vm385_vm1, %v1276_v17 }
  0x92   : > { %964 = vmatpush1.msk.msra.mxu0 %vm385_vm1, %v1283_v19 }
  0x93   : > { %965 = vmatmul.mubr.msk.f32.vlgmr.msra.gmra.mxu0 %vm381_vm2, %v374_v18 }
  0x94   : > { %625 = vmatprep.mubr.f32.mxu0 %v1108_v0 }
  0x96   : > { %v379_v25 = vpop.permute.xlu1 %378 }
  0x9a   : > { %v496_v40 = vpop.permute.xlu1 %495 }
  0x9c   : > { %v486_v42 = vpop.permute.xlu0 %485 }
  0x9e   : > { %v1371_v41 = vpop.permute.xlu1 %490 }
  0xa0   : > { %v1375_v44 = vpop.permute.xlu0 %500 }
  0xa2   : > { %v1373_v43 = vpop.permute.xlu1 %505 }
  0xa4   : > { %v1379_v46 = vpop.permute.xlu0 %510 }
  0xa6   : > { %v1377_v45 = vpop.permute.xlu1 %515 }
  0xa8   : > { %v1383_v48 = vpop.permute.xlu0 %520 }
  0xaa   : > { %v1381_v47 = vpop.permute.xlu1 %525 }
  0xac   : > { %v696_v49 = vpop.permute.xlu0 %695 }
  0xae   : > { %v698_v50 = vpop.permute.xlu1 %697 }
  0xb0   : > { %v694_v51 = vpop.permute.xlu0 %693 }
  0xb2   : > { %v685_v52 = vpop.permute.xlu1 %684 }
  0xb4   : > { %v687_v53 = vpop.permute.xlu0 %686 }
  0xb6   : > { %v709_v54 = vpop.permute.xlu1 %708 }
  0xb8   : > { %v711_v55 = vpop.permute.xlu0 %710 }
  0xba   : > { %v683_v56 = vpop.permute.xlu1 %682 }
  0xbb   : > { %v690_v20 = vsel %vm688_vm3, %v683_v56, %v685_v52 }
  0xbc   : > { %v707_v57 = vpop.permute.xlu0 %706 }
  0xbe   : > { %v726_v58 = vpop.permute.xlu1 %725 }
  0xc0   : > { %v728_v59 = vpop.permute.xlu0 %727 }
  0xc2   : > { %v739_v60 = vpop.permute.xlu1 %738 }
  0xc4   : > { %v741_v61 = vpop.permute.xlu0 %740 }
  0xc6   : > { %v724_v62 = vpop.permute.xlu1 %723 }
  0xc8   : > { %v737_v63 = vpop.permute.xlu0 %736 }
  0xcc   : > { %v1387_v7 = vpop.permute.xlu0 %753 }
  0xd0   : > { %v1395_v18 = vpop.permute.xlu0 %766 }
 0x153   : > { %v458_v24 = vpop.f32.mrf.mxu0 }
 0x154   : > { %v459_v26 = vadd.f32 %v458_v24, %v379_v25  ;;  %v731_v24 = vsel %vm729_vm4, %v724_v62, %v726_v58 }
 0x155   : > { %v460_v27 = vpop.f32.mrf.mxu0 }
 0x156   : > { %v461_v28 = vadd.f32 %v460_v27, %v379_v25  ;;  %v463_v30 = vmax.f32 %v459_v26, 0.0  ;;  %v701_v26 = vsel %vm699_vm5, %v694_v51, %v696_v49 }
 0x158   : > { %v464_v29 = vmax.f32 %v461_v28, 0.0 }
 0x15a   : > { %966 = vmatprep.subr.msk.mxu0 %vm385_vm1, %v464_v29  ;;  %992 = vmatprep.subr.msk.mxu1 %vm385_vm1, %v464_v29 }
 0x15b   : > { %967 = vmatpush1.msk.msra.mxu0 %vm385_vm1, %v463_v30  ;;  %993 = vmatpush1.msk.msra.mxu1 %vm385_vm1, %v463_v30  ;;  %v700_v30 = vsel %vm699_vm5, %v696_v49, %v698_v50 }
 0x15c   : > { %968 = vmatmul.mubr.msk.f32.vlgmr.msra.gmra.mxu0 %vm381_vm2, %v465_v31  ;;  %971 = vmatmul.mubr.msk.f32.vlgmr.msra.gmra.mxu1 %vm381_vm2, %v468_v32  ;;  %v689_v31 = vsel %vm688_vm3, %v685_v52, %v687_v53  ;;  %v763_v52 = vpop.permute.xlu0 %762 }
 0x15d   : > { %631 = vmatprep.mubr.f32.mxu0 %v1108_v0  ;;  %649 = vmatprep.mubr.f32.mxu1 %v1108_v0 }
 0x160   : > { %969 = vmatmul.mubr.msk.f32.gmra.mxu0 %vm381_vm2, %v466_v33  ;;  %972 = vmatmul.mubr.msk.f32.gmra.mxu1 %vm381_vm2, %v469_v34  ;;  %v713_v34 = vsel %vm712_vm7, %v709_v54, %v711_v55 }
 0x161   : > { %637 = vmatprep.mubr.f32.mxu0 %v1108_v0  ;;  %655 = vmatprep.mubr.f32.mxu1 %v1108_v0 }
 0x164   : > { %970 = vmatmul.mubr.msk.f32.gmra.mxu0 %vm381_vm2, %v467_v35  ;;  %973 = vmatmul.mubr.msk.f32.gmra.mxu1 %vm381_vm2, %v470_v36  ;;  %v714_v35 = vsel %vm712_vm7, %v707_v57, %v709_v54  ;;  %v744_v57 = vsel %vm742_vm8, %v737_v63, %v739_v60 }
 0x165   : > { %661 = vmatprep.mubr.f32.mxu1 %v1108_v0  ;;  %857 = vmatprep.mubr.f32.mxu0 %v1108_v0 }
 0x168   : > { %974 = vmatmul.mubr.msk.f32.gmra.mxu1 %vm381_vm2, %v471_v37 }
 0x169   : > { %667 = vmatprep.mubr.f32.mxu1 %v1108_v0 }
 0x16c   : > { %975 = vmatmul.mubr.msk.f32.gmra.mxu1 %vm381_vm2, %v472_v38  ;;  %v730_v38 = vsel %vm729_vm4, %v726_v58, %v728_v59 }
 0x16d   : > { %673 = vmatprep.mubr.f32.mxu1 %v1108_v0  ;;  %v1385_v0 = vpop.permute.xlu1 %751 }
 0x170   : > { %976 = vmatmul.mubr.msk.f32.gmra.mxu1 %vm381_vm2, %v473_v39 }
 0x171   : > { %v1389_v10 = vpop.permute.xlu1 %764 }
 0x175   : > { %v750_v25 = vpop.permute.xlu1 %749 }
 0x176   : > { %v757_v29 = vsel %vm755_vm6, %v750_v25, %v1385_v0 }
 0x179   : > { %v782_v13 = vpop.permute.xlu1 %781 }
 0x21c   : > { %v627_v1 = vpop.f32.mrf.mxu0  ;;  %v645_v4 = vpop.f32.mrf.mxu1 }
 0x21d   : > { %v628_v21 = vadd.f32 %v627_v1, %v486_v42 }
 0x21e   : > { %v629_v5 = vpop.f32.mrf.mxu0  ;;  %v647_v6 = vpop.f32.mrf.mxu1 }
 0x21f   : > { %v630_v27 = vadd.f32 %v629_v5, %v486_v42  ;;  %v680_v37 = vmul.f32 %v628_v21, %v1218_v2  ;;  %v648_v49 = vadd.f32 %v647_v6, %v1375_v44  ;;  %v743_v2 = vsel %vm742_vm8, %v739_v60, %v741_v61 }
 0x220   : > { %v633_v8 = vpop.f32.mrf.mxu0  ;;  %v651_v9 = vpop.f32.mrf.mxu1  ;;  %v770_v61 = vsel %vm768_vm9, %v763_v52, %v1389_v10 }
 0x221   : > { %v652_v39 = vadd.f32 %v651_v9, %v1373_v43  ;;  %v681_v42 = vmul.f32 %v630_v27, %v1223_v3  ;;  %v634_v53 = vadd.f32 %v633_v8, %v1371_v41  ;;  %v716_v5 = vmul.f32 %v713_v34, %v648_v49 }
 0x222   : > { %v635_v11 = vpop.f32.mrf.mxu0  ;;  %v653_v12 = vpop.f32.mrf.mxu1 }
 0x223   : > { %v636_v50 = vadd.f32 %v635_v11, %v1371_v41  ;;  %v654_v51 = vadd.f32 %v653_v12, %v1373_v43  ;;  %v646_v43 = vadd.f32 %v645_v4, %v1375_v44  ;;  %v719_v62 = vmul.f32 %v652_v39, %v1283_v19 }
 0x224   : > { %v639_v14 = vpop.f32.mrf.mxu0  ;;  %v657_v15 = vpop.f32.mrf.mxu1  ;;  %v691_v8 = vmul.f32 %v690_v20, %v634_v53 }
 0x225   : > { %v640_v16 = vadd.f32 %v639_v14, %v496_v40  ;;  %v658_v41 = vadd.f32 %v657_v15, %v1379_v46  ;;  %v692_v6 = vmul.f32 %v689_v31, %v636_v50  ;;  %v720_v60 = vmul.f32 %v654_v51, %v1276_v17 }
 0x226   : > { %v641_v22 = vpop.f32.mrf.mxu0  ;;  %v659_v23 = vpop.f32.mrf.mxu1  ;;  %v715_v14 = vmul.f32 %v714_v35, %v646_v43  ;;  %v756_v17 = vsel %vm755_vm6, %v1385_v0, %v1387_v7 }
 0x227   : > { %v642_v28 = vadd.f32 %v641_v22, %v496_v40  ;;  %v702_v32 = vmul.f32 %v701_v26, %v640_v16  ;;  %v660_v58 = vadd.f32 %v659_v23, %v1379_v46  ;;  %v732_v15 = vmul.f32 %v731_v24, %v658_v41 }
 0x228   : > { %v663_v33 = vpop.f32.mrf.mxu1  ;;  %v718_v21 = vadd.f32 %v716_v5, %v692_v6  ;;  %v769_v24 = vsel %vm768_vm9, %v1389_v10, %v1395_v18 }
 0x229   : > { %v703_v36 = vmul.f32 %v700_v30, %v642_v28  ;;  %v704_v54 = vadd.f32 %v702_v32, %v680_v37  ;;  %v664_v55 = vadd.f32 %v663_v33, %v1377_v45  ;;  %v733_v19 = vmul.f32 %v730_v38, %v660_v58 }
 0x22a   : > { %v665_v40 = vpop.f32.mrf.mxu1 }
 0x22b   : > { %v705_v3 = vadd.f32 %v703_v36, %v681_v42  ;;  %v666_v59 = vadd.f32 %v665_v40, %v1377_v45  ;;  %v721_v9 = vadd.f32 %v719_v62, %v704_v54  ;;  %v745_v45 = vmul.f32 %v744_v57, %v664_v55 }
 0x22c   : > { %v669_v56 = vpop.f32.mrf.mxu1  ;;  %v735_v27 = vadd.f32 %v733_v19, %v718_v21 }
 0x22d   : > { %v670_v44 = vadd.f32 %v669_v56, %v1383_v48  ;;  %v722_v11 = vadd.f32 %v720_v60, %v705_v3  ;;  %v746_v46 = vmul.f32 %v743_v2, %v666_v59  ;;  %v747_v25 = vadd.f32 %v745_v45, %v721_v9 }
 0x22e   : > { %v671_v1 = vpop.f32.mrf.mxu1 }
 0x22f   : > { %v672_v63 = vadd.f32 %v671_v1, %v1383_v48  ;;  %v717_v48 = vadd.f32 %v715_v14, %v691_v8  ;;  %v758_v26 = vmul.f32 %v757_v29, %v670_v44  ;;  %v748_v28 = vadd.f32 %v746_v46, %v722_v11  ;;  %v777_v29 = vld [vmem:[%s1494_s6] sm:$0xff] }
 0x230   : > { %v675_v4 = vpop.f32.mrf.mxu1 }
 0x231   : > { %v676_v12 = vadd.f32 %v675_v4, %v1381_v47  ;;  %v759_v20 = vmul.f32 %v756_v17, %v672_v63  ;;  %v734_v0 = vadd.f32 %v732_v15, %v717_v48 }
 0x232   : > { %v677_v16 = vpop.f32.mrf.mxu1 }
 0x233   : > { %v771_v22 = vmul.f32 %v770_v61, %v676_v12  ;;  %v678_v23 = vadd.f32 %v677_v16, %v1381_v47  ;;  %v761_v31 = vadd.f32 %v759_v20, %v735_v27  ;;  %v760_v33 = vadd.f32 %v758_v26, %v734_v0 }
 0x235   : > { %v772_v30 = vmul.f32 %v769_v24, %v678_v23  ;;  %v773_v7 = vadd.f32 %v771_v22, %v747_v25 }
 0x237   : > { %v774_v32 = vadd.f32 %v772_v30, %v748_v28  ;;  %v775_v47 = vadd.f32 %v773_v7, %v760_v33 }
 0x239   : > { %v776_v34 = vadd.f32 %v774_v32, %v761_v31 }
 0x23b   : > { %977 = vmatprep.subr.msk.mxu0 %vm385_vm1, %v776_v34 }
 0x23c   : > { %978 = vmatpush1.msk.msra.mxu0 %vm385_vm1, %v775_v47 }
 0x23d   : > { %979 = vmatmul.mubr.msk.f32.vlgmr.msra.gmra.mxu0 %vm381_vm2, %v777_v29 }
 0x2fd   : > { %v859_v10 = vpop.f32.mrf.mxu0 }
 0x2fe   : > { %v860_v18 = vadd.f32 %v859_v10, %v782_v13 }
 0x2ff   : > { %v861_v35 = vpop.f32.mrf.mxu0 }
 0x300   : > { %864 = vst [vmem:[%s334_s25] sm:$0xff] %v860_v18  ;;  %v862_v36 = vadd.f32 %v861_v35, %v782_v13 }
 0x302   : > { %865 = vst [vmem:[%s334_s25 + $0x8] sm:$0xff] %v862_v36 }
 0x303   : > { %1059 = shalt.err (!%p1056_p4)
}
 0x304   : > { %s1060_s10 = scalar_lea.hbm %s879_s13, 256  ;;  %s1064_s23 = scalar_lea.hbm %s1496_s8, 768 }
 0x305   : > { %p1061_p7 = scmp.ne.s32.totalorder %s879_s13, %s1060_s10  ;;  %p1065_p10 = scmp.lt.s32.totalorder %s879_s13, %s1496_s8 }
 0x306   : > { %p1066_p11 = scmp.lt.s32.totalorder %s1064_s23, %s1060_s10 }
 0x307   : > { %p1062_p8 = pnand %p1061_p7, %p1202_p5 }
 0x308   : > { %p1067_p12 = por %p1066_p11, %p1065_p10 }
 0x309   : > { %p1063_p9 = pneg %p1062_p8 }
 0x30b   : > { %p1068_p13 = pnand %p1067_p12, %p1063_p9 }
 0x30d   : > { %1071 = shalt.err (!%p1068_p13)
}
 0x30e   : > { %994 = dma.vmem_to_hbm [thread:$0]  (%p1202_p5), %s882_s19, 256, %s879_s13, %s867_s17  }
 0x30f PF: > { %p1000_p0 = scmp.ge.s32.totalorder %s1106_s30, 2  ;;  %s893_s12 = sand.u32 1, %s1094_s27  }
 0x310   : > { %s894_s18 = scalar_lea.sflag [#allocation3], %s893_s12 }
 0x311   : > { %p997_p1 = pnand %p1000_p0, %p1206_p6 }
 0x313   : > { %p998_p2 = pneg %p997_p1 }
 0x315   : > { %1089 = dma.done.wait (%p998_p2), %s894_s18, 256  }
 0x316   : > { %1091 = vsyncadd (%p998_p2), %s894_s18, 4294967040  ;;  %p18_p3 = scmp.ge.s32.totalorder %s1189_s11, 5   ;;  %s1504_s27 = smov %s1098_s28 }
 0x317   : > { %s1505_s28 = smov %s1102_s29  ;;  %s1506_s29 = smov %s1200_s14 }
 0x318   : > { %s1507_s30 = smov %s1189_s11  ;;  %20 = sbr.rel (!%p18_p3) target bundleno = 3 (0x3), region = 90 }
 0x31d   :  { %899 = vsyncpa [#allocation3], 1 }
 0x31e   :  { %901 = vsyncpa [#allocation3 + $0x1], 1 }

</bundles_post_ra>
